<compile_context>
chip_gen: v5e
topology: v5e:2x2
jax: 0.10.0
libtpu: 0.0.40
codegen_flags: <defaults>
</compile_context>

<pallas_src>
import jax
import jax.numpy as jnp
from jax.experimental import pallas as pl
from jax.experimental.pallas import tpu as pltpu


# ----------------------------- Pallas kernel --------------------------------

def _rsr2_loss_kernel(aa_ref, o_ref):
    """Accumulate sum((aa - 1)^2) over row blocks into an SMEM scalar, sqrt at end."""
    step = pl.program_id(0)

    @pl.when(step == 0)
    def _():
        o_ref[0, 0] = jnp.float32(0.0)

    r = aa_ref[...].astype(jnp.float32) - 1.0
    o_ref[0, 0] += jnp.sum(r * r)

    @pl.when(step == pl.num_programs(0) - 1)
    def _():
        o_ref[0, 0] = jnp.sqrt(o_ref[0, 0])


# ----------------------------- wrapper ---------------------------------------

def rsr2_loss(AA, *, block_rows=256):
    """||AA - ones_like(AA)||_F computed in a single Pallas kernel."""
    AA = jnp.asarray(AA)
    # torch.norm flattens; the Frobenius norm is invariant to this 2-D reshape.
    if AA.ndim == 0:
        AA = AA.reshape(1, 1)
    elif AA.ndim == 1:
        AA = AA.reshape(1, -1)
    elif AA.ndim > 2:
        AA = AA.reshape(-1, AA.shape[-1])

    R, C = AA.shape
    # Grid over rows only when blocks tile cleanly (block rows must be a
    # multiple of 8); otherwise a single full-array block (always legal).
    if R > block_rows and R % block_rows == 0 and block_rows % 8 == 0:
        bs = block_rows
    else:
        bs = R
    grid = (R // bs,)

    out = pl.pallas_call(
        _rsr2_loss_kernel,
        out_shape=jax.ShapeDtypeStruct((1, 1), jnp.float32),
        grid=grid,
        in_specs=[pl.BlockSpec((bs, C), lambda i: (i, 0))],
        out_specs=pl.BlockSpec(
            (1, 1), lambda i: (0, 0), memory_space=pltpu.MemorySpace.SMEM
        ),
        compiler_params=pltpu.CompilerParams(
            # Reduction axis carries the accumulator -> must be "arbitrary".
            dimension_semantics=("arbitrary",),
            # <= 64 MiB so it is valid on v7x as well as v5e/v6e.
            vmem_limit_bytes=32 * 1024 * 1024,
        ),
    )(AA)
    return out[0, 0]


# ----------------------------- main -------------------------------------------

if __name__ == "__main__":
    key = jax.random.PRNGKey(0)
    k1, k2 = jax.random.split(key)

    # Natural size from the RSRAE context: AA = A^T A is (d, d) with d = 10.
    AA_small = jax.random.normal(k1, (10, 10), dtype=jnp.float32)
    loss_small = jax.jit(rsr2_loss)(AA_small)
    jax.block_until_ready(loss_small)
    ref_small = jnp.linalg.norm(AA_small - jnp.ones_like(AA_small))
    assert jnp.allclose(loss_small, ref_small, rtol=1e-4, atol=1e-4), (
        loss_small, ref_small)

    # Larger case exercises the row-gridded accumulator path (grid = 2).
    AA_big = jax.random.normal(k2, (512, 384), dtype=jnp.float32)
    loss_big = jax.jit(rsr2_loss)(AA_big)
    jax.block_until_ready(loss_big)
    ref_big = jnp.linalg.norm(AA_big - jnp.ones_like(AA_big))
    assert jnp.allclose(loss_big, ref_big, rtol=1e-4, atol=1e-3), (
        loss_big, ref_big)

    print("KERNEL_OK")
</pallas_src>

<mosaic_0001>
module attributes {stable_mosaic.version = 11 : i64} {
  func.func @_rsr2_loss_kernel(%arg0: i32, %arg1: memref<10x10xf32, #tpu.memory_space<vmem>>, %arg2: memref<1x1xf32, #tpu.memory_space<smem>>) attributes {dimension_semantics = [#tpu.dimension_semantics<arbitrary>], iteration_bounds = array<i64: 1>, scalar_prefetch = 0 : i64, scratch_operands = 0 : i64, tpu.core_type = #tpu.core_type<tc>, window_params = [{transform_indices = @transform_0, window_bounds = array<i64: 10, 10>}, {transform_indices = @transform_1, window_bounds = array<i64: 1, 1>}]} {
    %c0_i32 = arith.constant 0 : i32
    %0 = arith.cmpi eq, %arg0, %c0_i32 : i32
    %1 = arith.extui %0 : i1 to i32
    %c0_i32_0 = arith.constant 0 : i32
    %2 = arith.cmpi ne, %1, %c0_i32_0 : i32
    scf.if %2 {
      %cst_9 = arith.constant 0.000000e+00 : f32
      %c0_10 = arith.constant 0 : index
      %c0_11 = arith.constant 0 : index
      %17 = memref.load %arg2[%c0_10, %c0_11] : memref<1x1xf32, #tpu.memory_space<smem>>
      memref.store %cst_9, %arg2[%c0_10, %c0_11] : memref<1x1xf32, #tpu.memory_space<smem>>
    } else {
    }
    %c0 = arith.constant 0 : index
    %c0_1 = arith.constant 0 : index
    %3 = vector.load %arg1[%c0, %c0_1] : memref<10x10xf32, #tpu.memory_space<vmem>>, vector<10x10xf32>
    %cst = arith.constant 1.000000e+00 : f32
    %4 = vector.broadcast %cst : f32 to vector<10x10xf32>
    %5 = arith.subf %3, %4 : vector<10x10xf32>
    %c0_2 = arith.constant 0 : index
    %c0_3 = arith.constant 0 : index
    %6 = memref.load %arg2[%c0_2, %c0_3] : memref<1x1xf32, #tpu.memory_space<smem>>
    %7 = arith.mulf %5, %5 : vector<10x10xf32>
    %8 = vector.shape_cast %7 : vector<10x10xf32> to vector<1x10x10xf32>
    %cst_4 = arith.constant dense<0.000000e+00> : vector<1xf32>
    %9 = vector.multi_reduction <add>, %8, %cst_4 [1, 2] : vector<1x10x10xf32> to vector<1xf32>
    %10 = vector.shape_cast %9 : vector<1xf32> to vector<1x1x1xf32>
    %11 = vector.extract %10[0, 0, 0] : f32 from vector<1x1x1xf32>
    %12 = arith.addf %6, %11 : f32
    %c0_5 = arith.constant 0 : index
    %c0_6 = arith.constant 0 : index
    %13 = memref.load %arg2[%c0_5, %c0_6] : memref<1x1xf32, #tpu.memory_space<smem>>
    memref.store %12, %arg2[%c0_5, %c0_6] : memref<1x1xf32, #tpu.memory_space<smem>>
    %c0_i32_7 = arith.constant 0 : i32
    %14 = arith.cmpi eq, %arg0, %c0_i32_7 : i32
    %15 = arith.extui %14 : i1 to i32
    %c0_i32_8 = arith.constant 0 : i32
    %16 = arith.cmpi ne, %15, %c0_i32_8 : i32
    scf.if %16 {
      %c0_9 = arith.constant 0 : index
      %c0_10 = arith.constant 0 : index
      %17 = memref.load %arg2[%c0_9, %c0_10] : memref<1x1xf32, #tpu.memory_space<smem>>
      %18 = math.sqrt %17 : f32
      %c0_11 = arith.constant 0 : index
      %c0_12 = arith.constant 0 : index
      %19 = memref.load %arg2[%c0_11, %c0_12] : memref<1x1xf32, #tpu.memory_space<smem>>
      memref.store %18, %arg2[%c0_11, %c0_12] : memref<1x1xf32, #tpu.memory_space<smem>>
    } else {
    }
    return
  }
  func.func @transform_0(%arg0: i32) -> (i32, i32) {
    %c0_i32 = arith.constant 0 : i32
    %c0_i32_0 = arith.constant 0 : i32
    return %arg0, %c0_i32 : i32, i32
  }
  func.func @transform_1(%arg0: i32) -> (i32, i32) {
    %c0_i32 = arith.constant 0 : i32
    %c0_i32_0 = arith.constant 0 : i32
    %c0_i32_1 = arith.constant 0 : i32
    return %c0_i32, %c0_i32_0 : i32, i32
  }
}

</mosaic_0001>

<bundles_post_ra>
// kernel: rsr2_loss.1
= control target key start
LH: loop header
LB: loop body
LE: loop exit
PB: predicated region body
PF: predicated region fallthrough
CT: control target
= control target key end

     0   :  { %6 = vsyncpa [#allocation3], 0  ;;  %s163_s0 = inlined_call_operand.hbm [shape: f32[10,10], index: 0, kind: input, shape index: {}]   ;;  %s164_s1 = inlined_call_operand.hbm [shape: f32[1,1], index: 1, kind: output, shape index: {}]  }
   0x1   :  { %7 = vsyncpa [#allocation4], 0  ;;  %s12_s8 = sshll.u32 %s163_s0, 4  ;;  %s143_s9 = smov [#allocation2]   ;;  %s13_s8 = int_to_ptr.hbm [resolvable:$true] %s12_s8 }
   0x2   :  { %s14_s10 = sshll.u32 %s143_s9, 4  ;;  %s144_s11 = smov 128   ;;  %s15_s10 = int_to_ptr.vmem [resolvable:$true] %s14_s10 }
   0x3   :  { %s145_s12 = smov 8  }
   0x4   :  { %20 = dma.hbm_to_vmem [thread:$0]  %s13_s8, 256, %s15_s10, [#allocation3], %s144_s11, %s144_s11, %s145_s12  }
   0x5   :  { %139 = dma.done.wait [#allocation3], 256  }
   0x6   :  { %140 = vsyncadd [#allocation3], 4294967040  ;;  %v31_v0 = vld [vmem:[#allocation2] sm:$0xff]  ;;  %v32_v1 = vld [vmem:[#allocation2 + $0x8] sm:$0x3]  ;;  %vm38_vm0 = vcmask 80896  }
   0x7   :  { %v90_v2 = vadd.f32 -1.0, %v31_v0  ;;  %v91_v3 = vadd.f32 -1.0, %v32_v1  ;;  %vm40_vm1 = vcmask 74752   ;;  %s79_s15 = sshll.u32 %s164_s1, 4  ;;  %s146_s17 = smov [#allocation5]   ;;  %s80_s15 = int_to_ptr.hbm [resolvable:$true] %s79_s15 }
   0x9   :  { %v36_v4 = vmul.f32 %v90_v2, %v90_v2  ;;  %v37_v5 = vmul.f32 %v91_v3, %v91_v3 }
   0xb   :  { %v39_v6 = vsel %vm38_vm0, %v36_v4, 0.0  ;;  %v41_v7 = vsel %vm40_vm1, %v37_v5, 0.0 }
   0xc   :  { %v42_v8 = vadd.f32 %v41_v7, %v39_v6 }
   0xe   :  { %43 = vadd.xlane.f32.xlu0 %v42_v8 }
  0x81   :  { %v44_v9 = vpop.xlane.xlu0 %43 }
  0x82   :  { %v45_v10 = vrot.slane %v44_v9, 4 }
  0x84   :  { %v46_v11 = vadd.f32 %v45_v10, %v44_v9 }
  0x86   :  { %v47_v12 = vrot.slane %v46_v11, 2 }
  0x88   :  { %v48_v13 = vadd.f32 %v47_v12, %v46_v11 }
  0x8a   :  { %v49_v14 = vrot.slane %v48_v13, 1 }
  0x8c   :  { %v50_v15 = vadd.f32 %v49_v14, %v48_v13 }
  0x8e   :  { %92 = vpush %v50_v15 }
  0xbf   :  { %s93_s0 = spop %92 }
  0xc0   :  { %v59_v16 = vstv %s93_s0 }
  0xc1   :  { %101 = vrsqrt.f32 %v59_v16  ;;  %vm67_vm2 = vcmp.eq.f32.partialorder %v59_v16, inf  ;;  %v70_v24 = vand.u32 2147483648, %v59_v16  ;;  %vm69_vm3 = vcmp.eq.f32.partialorder %v59_v16, 0.0 }
  0xc7   :  { %v102_v17 = vpop.eup %101 }
  0xc8   :  { %v61_v18 = vmul.f32 %v102_v17, %v59_v16 }
  0xca   :  { %v62_v19 = vmul.f32 %v102_v17, %v61_v18 }
  0xcc   :  { %v63_v20 = vmul.f32 0.5, %v62_v19 }
  0xce   :  { %v64_v21 = vsub.f32 1.5, %v63_v20 }
  0xd0   :  { %v65_v22 = vmul.f32 %v102_v17, %v64_v21 }
  0xd2   :  { %v66_v23 = vmul.f32 %v65_v22, %v59_v16 }
  0xd4   :  { %v68_v25 = vsel %vm67_vm2, %v59_v16, %v66_v23 }
  0xd5   :  { %v71_v26 = vsel %vm69_vm3, %v70_v24, %v68_v25 }
  0xd6   :  { %94 = vpush %v71_v26 }
 0x107   :  { %s95_s16 = spop %94 }
 0x108   :  { %73 = sst [smem:[#allocation5]] %s95_s16 }
 0x109   :  { %82 = dma.smem_to_hbm %s146_s17, 16, %s80_s15, [#allocation4]  }
 0x10a   :  { %141 = dma.done.wait [#allocation4], 16  }
 0x10b   :  { %142 = vsyncadd [#allocation4], 4294967280 }
 0x10c   :  { %87 = sfence }
 0x10d   :  { %88 = vsyncpa [#allocation3], 1 }
 0x10e   :  { %89 = vsyncpa [#allocation4], 1 }

</bundles_post_ra>
